<compile_context>
chip_gen: v7x
topology: tpu7x:2x2x1
jax: 0.10.0
libtpu: 0.0.40
codegen_flags: <defaults>
</compile_context>

<pallas_src>
import math
import functools

import jax
import jax.numpy as jnp
from jax.experimental import pallas as pl
from jax.experimental.pallas import tpu as pltpu


def _int_pow(x, n: int):
    """x ** n for a static positive integer n via a multiply chain (unrolled)."""
    assert n >= 1
    result = None
    base = x
    while True:
        if n & 1:
            result = base if result is None else result * base
        n >>= 1
        if n == 0:
            break
        base = base * base
    return result


def _bessel_kernel(r_ref, w_ref, emb_ref, cut_ref, *, rmax_recip, p, p_is_int, inv_pi):
    r = r_ref[...]                       # (8, C)  edges on (sublane, lane)
    w = w_ref[...]                       # (NB, 1, 1)

    x = r * rmax_recip                   # (8, C)

    # --- polynomial cutoff (DimeNet-style), Horner form ----------------------
    # 1 - c0*x^p + c1*x^(p+1) - c2*x^(p+2) == 1 + x^p * (x*(c1 - c2*x) - c0)
    c0 = (p + 1.0) * (p + 2.0) / 2.0
    c1 = p * (p + 2.0)
    c2 = p * (p + 1.0) / 2.0
    if p_is_int:
        xp = _int_pow(x, int(round(p)))          # VPU multiply chain
    else:
        xp = jnp.exp(p * jnp.log(x))             # EUP fallback, non-integer p
    out = 1.0 + xp * (x * (c1 - c2 * x) - c0)
    cutoff = jnp.where(x < 1.0, out, 0.0)        # (8, C)

    # --- per-edge reciprocal (EUP approx + 1 Newton step), fold 1/pi + cutoff
    inv0 = pl.reciprocal(x, approx=True)
    inv = inv0 * (2.0 - x * inv0)                # refined 1/x
    scale = cutoff * (inv * inv_pi)              # (8, C)

    # --- normalized sinc-like Bessel basis; broadcast over leading NB dim ----
    s = jnp.sin(r[None, :, :] * w)               # (NB, 8, C)
    emb_ref[...] = s * scale[None, :, :]         # (NB, 8, C), lane-dense store
    cut_ref[...] = cutoff                        # (8, C)


def _round_up(n: int, m: int) -> int:
    return ((n + m - 1) // m) * m


def allegro_bessel_basis(
    r,
    bessel_weights,
    *,
    r_max,
    p=6.0,
    tile_e_max=65536,
    min_grid_steps=2,
    module_layout=False,
):
    """r: (E,) edge lengths; bessel_weights: (NB,).

    Default (fast) return: (edge_embedding_t (NB, E_pad), edge_cutoff (E_pad,)).
    Columns [:E] are the valid edges; padded columns are exactly zero
    (padded with r = r_max  ->  cutoff == 0).

    module_layout=True reproduces the torch module's (E, NB) / (E, 1) shapes
    (costs a full transpose of the embedding — avoid on the hot path).
    """
    E = int(r.shape[0])
    NB = int(bessel_weights.shape[0])

    # Edge tiles are viewed as (8 sublanes, C lanes): tile_e must be a
    # multiple of 8*128 = 1024 so C is lane-aligned.
    EDGE_UNIT = 8 * 128
    tile_e_max = max(EDGE_UNIT, (int(tile_e_max) // EDGE_UNIT) * EDGE_UNIT)

    E1 = max(E, 1)
    E_pad1 = _round_up(E1, EDGE_UNIT)
    # Large tiles (per-step >> 0.35us overhead), but keep >= min_grid_steps
    # grid steps when there is enough work so v7x's 2 TCs both get a share.
    n_steps = max(int(min_grid_steps), pl.cdiv(E_pad1, tile_e_max))
    tile_e = _round_up(pl.cdiv(E_pad1, n_steps), EDGE_UNIT)
    grid = pl.cdiv(E_pad1, tile_e)
    E_pad = grid * tile_e
    C = tile_e // 8              # lanes per sublane row
    G8 = E_pad // C              # total sublane rows (= grid * 8)

    # Pad with r = r_max so padded edges give x == 1 -> cutoff == 0, emb == 0
    # (no div-by-zero / NaN on the padding).
    r_pad = jnp.pad(r.astype(jnp.float32), (0, E_pad - E),
                    constant_values=float(r_max))
    r2 = r_pad.reshape(G8, C)
    w3 = bessel_weights.astype(jnp.float32).reshape(NB, 1, 1)

    p = float(p)
    p_is_int = bool(abs(p - round(p)) < 1e-6 and p >= 1.0)

    kernel = functools.partial(
        _bessel_kernel,
        rmax_recip=float(1.0 / r_max),
        p=p,
        p_is_int=p_is_int,
        inv_pi=float(1.0 / math.pi),
    )

    cost = pl.CostEstimate(
        flops=int(30 * NB * E_pad),
        transcendentals=int((NB + 1) * E_pad),
        bytes_accessed=int((NB + 2) * E_pad * 4),
    )

    emb3, cut3 = pl.pallas_call(
        kernel,
        out_shape=(
            jax.ShapeDtypeStruct((NB, G8, C), jnp.float32),
            jax.ShapeDtypeStruct((G8, C), jnp.float32),
        ),
        grid_spec=pltpu.PrefetchScalarGridSpec(
            num_scalar_prefetch=0,
            grid=(grid,),
            in_specs=[
                pl.BlockSpec((8, C), lambda i: (i, 0)),        # r (all sublanes)
                pl.BlockSpec((NB, 1, 1), lambda i: (0, 0, 0)),  # w (resident)
            ],
            out_specs=[
                pl.BlockSpec((NB, 8, C), lambda i: (0, i, 0)),  # edge_embedding^T
                pl.BlockSpec((8, C), lambda i: (i, 0)),         # edge_cutoff
            ],
        ),
        compiler_params=pltpu.CompilerParams(
            dimension_semantics=("parallel",),
        ),
        cost_estimate=cost,
    )(r2, w3)

    # Free (contiguous) reshapes back to flat-edge layouts.
    emb_t = emb3.reshape(NB, E_pad)      # (NB, E_pad)
    cutoff = cut3.reshape(E_pad)         # (E_pad,)

    if module_layout:
        # Layout plumbing to the torch module's convention (test/parity only):
        # costs a full HBM transpose of the embedding.
        return emb_t[:, :E].T, cutoff[:E].reshape(E, 1)
    return emb_t, cutoff


def reference(r, bessel_weights, *, r_max, p=6.0):
    """Pure-JAX mirror of the torch forward (non-per-edge-type path)."""
    r = r.reshape(-1, 1).astype(jnp.float32)
    rmax_recip = 1.0 / r_max
    x = r * rmax_recip
    bessel = jnp.sin(r * bessel_weights.reshape(1, -1)) / (math.pi * x)
    out = 1.0
    out = out - (p + 1.0) * (p + 2.0) / 2.0 * jnp.power(x, p)
    out = out + p * (p + 2.0) * jnp.power(x, p + 1.0)
    out = out - p * (p + 1.0) / 2.0 * jnp.power(x, p + 2.0)
    cutoff = out * (x < 1.0)
    return bessel * cutoff, cutoff


if __name__ == "__main__":
    key = jax.random.PRNGKey(0)

    # module hyperparameters
    r_max = 5.0
    num_bessels_per_basis = 8
    PolynomialCutoff_p = 6.0

    # deterministic parameter init (as in __init__, per_edge_type_cutoff=None):
    # bessel_weights = linspace(1, NB, NB) * pi / r_max
    bessel_weights = (
        jnp.linspace(1.0, num_bessels_per_basis, num_bessels_per_basis)
        * (math.pi / r_max)
    ).astype(jnp.float32)

    # --- case 1: graph glue (positions + edge_index -> edge lengths) --------
    n_atoms = 16
    n_edges = 200  # not a multiple of the 1024-edge tile unit -> exercises padding
    k_pos, k_src, k_dst, k_r2 = jax.random.split(key, 4)
    pos = jax.random.uniform(k_pos, (n_atoms, 3), jnp.float32, 0.0, 4.0)
    src = jax.random.randint(k_src, (n_edges,), 0, n_atoms)
    dst = (src + 1 + jax.random.randint(k_dst, (n_edges,), 0, n_atoms - 1)) % n_atoms
    edge_vec = pos[dst] - pos[src]
    edge_len = jnp.linalg.norm(edge_vec, axis=-1)          # (E,), all > 0

    emb_t, cut = allegro_bessel_basis(
        edge_len, bessel_weights, r_max=r_max, p=PolynomialCutoff_p
    )
    emb_t = jax.block_until_ready(emb_t)
    cut = jax.block_until_ready(cut)

    emb_ref, cut_ref = reference(
        edge_len, bessel_weights, r_max=r_max, p=PolynomialCutoff_p
    )
    assert emb_t.shape[0] == num_bessels_per_basis
    assert emb_t.shape[1] >= n_edges and emb_t.shape[1] == cut.shape[0]
    # valid edges match the torch math; padded columns are exactly zero
    assert jnp.allclose(emb_t[:, :n_edges].T, emb_ref, atol=1e-4, rtol=1e-4)
    assert jnp.allclose(cut[:n_edges, None], cut_ref, atol=1e-4, rtol=1e-4)
    assert jnp.all(emb_t[:, n_edges:] == 0.0)
    assert jnp.all(cut[n_edges:] == 0.0)

    # module-layout parity path (layout plumbing, test only)
    emb_m, cut_m = allegro_bessel_basis(
        edge_len, bessel_weights, r_max=r_max, p=PolynomialCutoff_p,
        module_layout=True,
    )
    emb_m = jax.block_until_ready(emb_m)
    assert emb_m.shape == (n_edges, num_bessels_per_basis)
    assert cut_m.shape == (n_edges, 1)
    assert jnp.allclose(emb_m, emb_ref, atol=1e-4, rtol=1e-4)
    assert jnp.allclose(cut_m, cut_ref, atol=1e-4, rtol=1e-4)

    # --- case 2: multi-step grid + r > r_max branch --------------------------
    n_edges2 = 3000  # -> 2 grid steps of tile_e = 2048 edges
    r2 = jax.random.uniform(k_r2, (n_edges2,), jnp.float32, 0.2, 6.0)
    emb2_t, cut2 = allegro_bessel_basis(
        r2, bessel_weights, r_max=r_max, p=PolynomialCutoff_p, tile_e_max=2048
    )
    emb2_t = jax.block_until_ready(emb2_t)
    cut2 = jax.block_until_ready(cut2)
    emb2_ref, cut2_ref = reference(
        r2, bessel_weights, r_max=r_max, p=PolynomialCutoff_p
    )
    assert jnp.allclose(emb2_t[:, :n_edges2].T, emb2_ref, atol=1e-4, rtol=1e-4)
    assert jnp.allclose(cut2[:n_edges2, None], cut2_ref, atol=1e-4, rtol=1e-4)

    print("KERNEL_OK")
</pallas_src>

<mosaic_0001>
module attributes {stable_mosaic.version = 11 : i64} {
  func.func @_bessel_kernel(%arg0: i32, %arg1: memref<8x128xf32, #tpu.memory_space<vmem>>, %arg2: memref<8x1x1xf32, #tpu.memory_space<vmem>>, %arg3: memref<8x8x128xf32, #tpu.memory_space<vmem>>, %arg4: memref<8x128xf32, #tpu.memory_space<vmem>>) attributes {dimension_semantics = [#tpu.dimension_semantics<parallel>], iteration_bounds = array<i64: 1>, scalar_prefetch = 0 : i64, scratch_operands = 0 : i64, tpu.core_type = #tpu.core_type<tc>, window_params = [{transform_indices = @transform_0, window_bounds = array<i64: 8, 128>}, {pipeline_mode = #tpu.pipeline_mode<synchronous>, transform_indices = @transform_1, window_bounds = array<i64: 8, 1, 1>}, {transform_indices = @transform_2, window_bounds = array<i64: 8, 8, 128>}, {transform_indices = @transform_3, window_bounds = array<i64: 8, 128>}]} {
    %c0 = arith.constant 0 : index
    %c0_0 = arith.constant 0 : index
    %0 = vector.load %arg1[%c0, %c0_0] : memref<8x128xf32, #tpu.memory_space<vmem>>, vector<8x128xf32>
    %c0_1 = arith.constant 0 : index
    %c0_2 = arith.constant 0 : index
    %c0_3 = arith.constant 0 : index
    %1 = vector.load %arg2[%c0_1, %c0_2, %c0_3] : memref<8x1x1xf32, #tpu.memory_space<vmem>>, vector<8x1x1xf32>
    %cst = arith.constant 2.000000e-01 : f32
    %2 = vector.broadcast %cst : f32 to vector<8x128xf32>
    %3 = arith.mulf %0, %2 : vector<8x128xf32>
    %4 = arith.mulf %3, %3 : vector<8x128xf32>
    %5 = arith.mulf %4, %4 : vector<8x128xf32>
    %6 = arith.mulf %4, %5 : vector<8x128xf32>
    %cst_4 = arith.constant 2.100000e+01 : f32
    %7 = vector.broadcast %cst_4 : f32 to vector<8x128xf32>
    %8 = arith.mulf %7, %3 : vector<8x128xf32>
    %cst_5 = arith.constant 4.800000e+01 : f32
    %9 = vector.broadcast %cst_5 : f32 to vector<8x128xf32>
    %10 = arith.subf %9, %8 : vector<8x128xf32>
    %11 = arith.mulf %3, %10 : vector<8x128xf32>
    %cst_6 = arith.constant 2.800000e+01 : f32
    %12 = vector.broadcast %cst_6 : f32 to vector<8x128xf32>
    %13 = arith.subf %11, %12 : vector<8x128xf32>
    %14 = arith.mulf %6, %13 : vector<8x128xf32>
    %cst_7 = arith.constant 1.000000e+00 : f32
    %15 = vector.broadcast %cst_7 : f32 to vector<8x128xf32>
    %16 = arith.addf %15, %14 : vector<8x128xf32>
    %cst_8 = arith.constant 1.000000e+00 : f32
    %17 = vector.broadcast %cst_8 : f32 to vector<8x128xf32>
    %18 = arith.cmpf olt, %3, %17 : vector<8x128xf32>
    %cst_9 = arith.constant 0.000000e+00 : f32
    %19 = vector.broadcast %cst_9 : f32 to vector<8x128xf32>
    %20 = arith.select %18, %16, %19 : vector<8x128xi1>, vector<8x128xf32>
    %21 = tpu.reciprocal %3 {approx = true} : vector<8x128xf32> -> vector<8x128xf32>
    %22 = arith.mulf %3, %21 : vector<8x128xf32>
    %cst_10 = arith.constant 2.000000e+00 : f32
    %23 = vector.broadcast %cst_10 : f32 to vector<8x128xf32>
    %24 = arith.subf %23, %22 : vector<8x128xf32>
    %25 = arith.mulf %21, %24 : vector<8x128xf32>
    %cst_11 = arith.constant 0.318309873 : f32
    %26 = vector.broadcast %cst_11 : f32 to vector<8x128xf32>
    %27 = arith.mulf %25, %26 : vector<8x128xf32>
    %28 = arith.mulf %20, %27 : vector<8x128xf32>
    %29 = vector.shape_cast %0 : vector<8x128xf32> to vector<1x8x128xf32>
    %30 = vector.broadcast %29 : vector<1x8x128xf32> to vector<8x8x128xf32>
    %31 = vector.broadcast %1 : vector<8x1x1xf32> to vector<8x8x128xf32>
    %32 = arith.mulf %30, %31 : vector<8x8x128xf32>
    %33 = math.sin %32 : vector<8x8x128xf32>
    %34 = vector.shape_cast %28 : vector<8x128xf32> to vector<1x8x128xf32>
    %35 = vector.broadcast %34 : vector<1x8x128xf32> to vector<8x8x128xf32>
    %36 = arith.mulf %33, %35 : vector<8x8x128xf32>
    %c0_12 = arith.constant 0 : index
    %c0_13 = arith.constant 0 : index
    %c0_14 = arith.constant 0 : index
    %37 = vector.load %arg3[%c0_12, %c0_13, %c0_14] : memref<8x8x128xf32, #tpu.memory_space<vmem>>, vector<8x8x128xf32>
    tpu.vector_store %arg3[%c0_12, %c0_13, %c0_14], %36 {strides = array<i32>} : memref<8x8x128xf32, #tpu.memory_space<vmem>>, vector<8x8x128xf32>,
    %c0_15 = arith.constant 0 : index
    %c0_16 = arith.constant 0 : index
    %38 = vector.load %arg4[%c0_15, %c0_16] : memref<8x128xf32, #tpu.memory_space<vmem>>, vector<8x128xf32>
    tpu.vector_store %arg4[%c0_15, %c0_16], %20 {strides = array<i32>} : memref<8x128xf32, #tpu.memory_space<vmem>>, vector<8x128xf32>,
    return
  }
  func.func @transform_0(%arg0: i32) -> (i32, i32) {
    %c0_i32 = arith.constant 0 : i32
    %c0_i32_0 = arith.constant 0 : i32
    return %arg0, %c0_i32 : i32, i32
  }
  func.func @transform_1(%arg0: i32) -> (i32, i32, i32) {
    %c0_i32 = arith.constant 0 : i32
    %c0_i32_0 = arith.constant 0 : i32
    %c0_i32_1 = arith.constant 0 : i32
    %c0_i32_2 = arith.constant 0 : i32
    return %c0_i32, %c0_i32_0, %c0_i32_1 : i32, i32, i32
  }
  func.func @transform_2(%arg0: i32) -> (i32, i32, i32) {
    %c0_i32 = arith.constant 0 : i32
    %c0_i32_0 = arith.constant 0 : i32
    %c0_i32_1 = arith.constant 0 : i32
    return %c0_i32, %arg0, %c0_i32_0 : i32, i32, i32
  }
  func.func @transform_3(%arg0: i32) -> (i32, i32) {
    %c0_i32 = arith.constant 0 : i32
    %c0_i32_0 = arith.constant 0 : i32
    return %arg0, %c0_i32 : i32, i32
  }
}

</mosaic_0001>

<bundles_post_ra>
// kernel: tpu_custom_call.1
= control target key start
LH: loop header
LB: loop body
LE: loop exit
PB: predicated region body
PF: predicated region fallthrough
CT: control target
= control target key end

     0   :  { %9 = vsyncpa [#allocation3], 0  ;;  %v1170_v2 = vmov 0   ;;  %s1871_s0 = inlined_call_operand.vmem [shape: f32[8,128], index: 0, kind: input, shape index: {}]   ;;  %s1872_s1 = inlined_call_operand.vmem [shape: f32[8,1,1], index: 1, kind: input, shape index: {}]   ;;  %s1873_s2 = inlined_call_operand.hbm [shape: f32[8,8,128], index: 2, kind: output, shape index: {0}]   ;;  %s1874_s3 = inlined_call_operand.hbm [shape: f32[8,128], index: 3, kind: output, shape index: {1}]  }
   0x1   :  { %v1004_v0 = vld [vmem:[%s1872_s1 + $0x2] ss:$0 sm:$0xff]  ;;  %v1002_v1 = vld [vmem:[%s1872_s1] ss:$0 sm:$0xff]  ;;  %1086 = vset.pattern.permute.xlu1 %v1170_v2  ;;  %1085 = vset.pattern.permute.xlu0 %v1170_v2  ;;  %v1005_v3 = vld [vmem:[%s1872_s1 + $0x3] ss:$0 sm:$0xff] }
   0x2   :  { %91 = vperm.xlu1 %1086, %v1004_v0   ;;  %83 = vperm.xlu0 %1085, %v1002_v1   ;;  %v1003_v4 = vld [vmem:[%s1872_s1 + $0x1] ss:$0 sm:$0xff] }
   0x3   :  { %v1216_v5 = vld [vmem:[%s1871_s0] sm:$0xff] }
   0x4   :  { %10 = vsyncpa [#allocation5], 0  ;;  %v24_v6 = vmul.f32 0.2, %v1216_v5  ;;  %v1007_v7 = vld [vmem:[%s1872_s1 + $0x5] ss:$0 sm:$0xff] }
   0x5   :  { %v1006_v8 = vld [vmem:[%s1872_s1 + $0x4] ss:$0 sm:$0xff]  ;;  %v1009_v13 = vld [vmem:[%s1872_s1 + $0x7] ss:$0 sm:$0xff]  ;;  %v1008_v14 = vld [vmem:[%s1872_s1 + $0x6] ss:$0 sm:$0xff] }
   0x6   :  { %95 = vperm.xlu1 %1086, %v1005_v3   ;;  %87 = vperm.xlu0 %1085, %v1003_v4   ;;  %v25_v9 = vmul.f32 %v24_v6, %v24_v6  ;;  %v28_v10 = vmul.f32 21.0, %v24_v6  ;;  %1087 = vrcp.f32 %v24_v6  ;;  %vm34_vm0 = vcmp.lt.f32.partialorder %v24_v6, 1.0  ;;  %s1177_s1 = smov [#allocation4]  }
   0x7   :  { %v1171_v62 = vmov 683565275   ;;  %v1172_v2 = vmov 2475754826   ;;  %v1173_v4 = vmov 2131351028  }
   0x8   :  { %v26_v11 = vmul.f32 %v25_v9, %v25_v9  ;;  %v29_v12 = vsub.f32 48.0, %v28_v10  ;;  %s989_s30 = sshll.u32 %s1177_s1, 4  ;;  %s990_s30 = int_to_ptr.vmem [resolvable:$true] %s989_s30 }
   0x9   :  { %s1122_s4 = scalar_lea.vmem %s990_s30, 128  ;;  %p1127_p1 = scmp.lt.s32.totalorder %s990_s30, %s990_s30 }
   0xa   :  { %103 = vperm.xlu1 %1086, %v1007_v7   ;;  %99 = vperm.xlu0 %1085, %v1006_v8   ;;  %v27_v15 = vmul.f32 %v26_v11, %v25_v9  ;;  %v30_v16 = vmul.f32 %v29_v12, %v24_v6  ;;  %v1174_v7 = vmov 2102212464   ;;  %v1175_v9 = vmov 920167782   ;;  %p1123_p0 = scmp.ne.s32.totalorder %s990_s30, %s1122_s4  ;;  %p1128_p2 = scmp.lt.s32.totalorder %s1122_s4, %s1122_s4 }
   0xc   :  { %v1001_v17 = vadd.f32 -28.0, %v30_v16  ;;  %v1176_v16 = vmov 1326507024   ;;  %p1129_p3 = por %p1128_p2, %p1127_p1 }
   0xe   :  { %111 = vperm.xlu1 %1086, %v1009_v13   ;;  %107 = vperm.xlu0 %1085, %v1008_v14   ;;  %v32_v18 = vmul.f32 %v1001_v17, %v27_v15  ;;  %p1130_p4 = pnand %p1129_p3, %p1123_p0 }
  0x10   :  { %v1088_v19 = vpop.eup %1087  ;;  %v33_v20 = vadd.f32 1.0, %v32_v18 }
  0x11   :  { %v37_v21 = vmul.f32 %v1088_v19, %v24_v6 }
  0x12   :  { %v35_v22 = vsel %vm34_vm0, %v33_v20, 0.0 }
  0x13   :  { %v38_v23 = vsub.f32 2.0, %v37_v21  ;;  %970 = vst [vmem:[#allocation4] sm:$0xff] %v35_v22 }
  0x15   :  { %v39_v24 = vmul.f32 %v1088_v19, %v38_v23 }
  0x17   :  { %v40_v25 = vmul.f32 0.31830987, %v39_v24 }
  0x19   :  { %v1231_v26 = vmul.f32 %v40_v25, %v35_v22 }
  0x81   :  { %v92_v27 = vpop.permute.xlu1 %91  ;;  %v84_v28 = vpop.permute.xlu0 %83 }
  0x82   :  { %v1234_v29 = vmul.f32 %v92_v27, %v1216_v5  ;;  %v1237_v30 = vmul.f32 %v84_v28, %v1216_v5 }
  0x84   :  { %v330_v31 = vand.u32 2147483647, %v1234_v29  ;;  %v333_v32 = vand.u32 2139095040, %v1234_v29  ;;  %v122_v33 = vand.u32 2147483647, %v1237_v30  ;;  %v125_v34 = vand.u32 2139095040, %v1237_v30 }
  0x85   :  { %v96_v35 = vpop.permute.xlu1 %95  ;;  %v88_v50 = vpop.permute.xlu0 %87  ;;  %vm332_vm14 = vcmp.lt.s32.totalorder %v1234_v29, 0  ;;  %vm124_vm0 = vcmp.lt.s32.totalorder %v1237_v30, 0 }
  0x86   :  { %v334_v36 = vshrl.u32 %v333_v32, 23  ;;  %v337_v37 = vand.u32 8388607, %v330_v31  ;;  %v1246_v38 = vmul.f32 %v96_v35, %v1216_v5  ;;  %v126_v39 = vshrl.u32 %v125_v34, 23 }
  0x87   :  { %v129_v40 = vand.u32 8388607, %v122_v33  ;;  %v1253_v56 = vmul.f32 %v88_v50, %v1216_v5  ;;  %vm1360_vm15 = vcmp.le.f32.partialorder %v330_v31, 0.7853982 }
  0x88   :  { %v1018_v41 = vadd.s32 4294967169, %v334_v36  ;;  %v1010_v42 = vadd.s32 4294967169, %v126_v39  ;;  %v437_v43 = vand.u32 2139095040, %v1246_v38  ;;  %v338_v44 = vor.u32 8388608, %v337_v37 }
  0x89   :  { %v130_v46 = vor.u32 8388608, %v129_v40  ;;  %v434_v48 = vand.u32 2147483647, %v1246_v38 }
  0x8a   :  { %v340_v45 = vadd.s32 1, %v1018_v41  ;;  %v132_v47 = vadd.s32 1, %v1010_v42  ;;  %v438_v49 = vshrl.u32 %v437_v43, 23  ;;  %v1255_v57 = vshll.u32 %v338_v44, 8 }
  0x8b   :  { %v1259_v59 = vshll.u32 %v130_v46, 8  ;;  %v1263_v60 = vand.u32 8388607, %v434_v48 }
  0x8c   :  { %vm341_vm1 = vcmp.gt.s32.totalorder %v340_v45, 0  ;;  %vm133_vm2 = vcmp.gt.s32.totalorder %v132_v47, 0  ;;  %v1022_v52 = vadd.s32 4294967169, %v438_v49 }
  0x8d   :  { %v342_v51 = vsel %vm341_vm1, %v340_v45, 0  ;;  %v134_v55 = vsel %vm133_vm2, %v132_v47, 0 }
  0x8e   :  { %v343_v53 = vshrl.u32 %v342_v51, 5  ;;  %v344_v54 = vand.u32 31, %v342_v51  ;;  %v1257_v58 = vshrl.u32 %v134_v55, 5  ;;  %v136_v0 = vand.u32 31, %v134_v55 }
  0x8f   :  { %v1266_v1 = vadd.s32 1, %v1022_v52 }
  0x90   :  { %v345_v61 = vsub.s32 32, %v344_v54  ;;  %v347_v63 = vshll.u32 %v1171_v62, %v344_v54  ;;  %v350_v3 = vshll.u32 %v1172_v2, %v344_v54  ;;  %v353_v6 = vshll.u32 %v1173_v4, %v344_v54 }
  0x91   :  { %v356_v8 = vshll.u32 %v1174_v7, %v344_v54  ;;  %v359_v10 = vshll.u32 %v1175_v9, %v344_v54  ;;  %vm362_vm3 = vcmp.lt.s32.totalorder %v343_v53, 1  ;;  %vm363_vm4 = vcmp.lt.s32.totalorder %v343_v53, 2 }
  0x92   :  { %v348_v11 = vshrl.u32 %v1172_v2, %v345_v61  ;;  %v351_v12 = vshrl.u32 %v1173_v4, %v345_v61  ;;  %v354_v13 = vshrl.u32 %v1174_v7, %v345_v61  ;;  %v346_v14 = vshrl.u32 %v1171_v62, %v345_v61 }
  0x93   :  { %v357_v15 = vshrl.u32 %v1175_v9, %v345_v61  ;;  %v360_v17 = vshrl.u32 %v1176_v16, %v345_v61  ;;  %v137_v21 = vsub.s32 32, %v136_v0  ;;  %vm364_vm5 = vcmp.lt.s32.totalorder %v343_v53, 3 }
  0x94   :  { %v349_v18 = vor.u32 %v348_v11, %v347_v63  ;;  %v352_v19 = vor.u32 %v351_v12, %v350_v3  ;;  %v355_v20 = vor.u32 %v354_v13, %v353_v6  ;;  %vm365_vm6 = vcmp.lt.s32.totalorder %v343_v53, 4 }
  0x95   :  { %v358_v22 = vor.u32 %v357_v15, %v356_v8  ;;  %v361_v23 = vor.u32 %v360_v17, %v359_v10  ;;  %v139_v36 = vshll.u32 %v1171_v62, %v136_v0  ;;  %v140_v40 = vshrl.u32 %v1172_v2, %v137_v21 }
  0x96   :  { %v366_v24 = vsel %vm362_vm3, %v346_v14, %v349_v18  ;;  %v367_v25 = vsel %vm365_vm6, %v355_v20, 2102212464  ;;  %v370_v27 = vsel %vm362_vm3, %v349_v18, %v352_v19  ;;  %v374_v28 = vsel %vm362_vm3, %v352_v19, %v355_v20 }
  0x97   :  { %v368_v32 = vsel %vm364_vm5, %v352_v19, %v367_v25  ;;  %v371_v34 = vsel %vm365_vm6, %v358_v22, 920167782  ;;  %v375_v35 = vsel %vm365_vm6, %v361_v23, 1326507024  ;;  %v142_v41 = vshll.u32 %v1172_v2, %v136_v0 }
  0x98   :  { %v372_v37 = vsel %vm364_vm5, %v355_v20, %v371_v34  ;;  %v376_v39 = vsel %vm364_vm5, %v358_v22, %v375_v35  ;;  %v369_v42 = vsel %vm363_vm4, %v366_v24, %v368_v32  ;;  %v143_v45 = vshrl.u32 %v1173_v4, %v137_v21 }
  0x99   :  { %v373_v43 = vsel %vm363_vm4, %v370_v27, %v372_v37  ;;  %v377_v44 = vsel %vm363_vm4, %v374_v28, %v376_v39  ;;  %v141_v51 = vor.u32 %v140_v40, %v139_v36  ;;  %v145_v54 = vshll.u32 %v1173_v4, %v136_v0 }
  0x9a   :  { %v1289_v46 = vmul.u32.u64.low %v1255_v57, %v377_v44  ;;  %v1290_v47 = vmul.u32.u64.high %v1255_v57, %v377_v44, %v1289_v46  ;;  %v1293_v49 = vmul.u32.u64.low %v1255_v57, %v373_v43  ;;  %v1294_v50 = vmul.u32.u64.high %v1255_v57, %v373_v43, %v1293_v49 }
  0x9b   :  { %v144_v52 = vor.u32 %v143_v45, %v142_v41  ;;  %v146_v55 = vshrl.u32 %v1174_v7, %v137_v21  ;;  %v138_v61 = vshrl.u32 %v1171_v62, %v137_v21  ;;  %v148_v53 = vshll.u32 %v1174_v7, %v136_v0 }
  0x9c   :  { %v149_v63 = vshrl.u32 %v1175_v9, %v137_v21  ;;  %v152_v3 = vshrl.u32 %v1176_v16, %v137_v21  ;;  %v385_v6 = vmul.u32 %v1255_v57, %v369_v42  ;;  %v151_v10 = vshll.u32 %v1175_v9, %v136_v0 }
  0x9d   :  { %v147_v8 = vor.u32 %v146_v55, %v145_v54  ;;  %vm154_vm7 = vcmp.lt.s32.totalorder %v1257_v58, 1  ;;  %vm387_vm8 = vc.u32 %v1290_v47, %v1293_v49  ;;  %v388_v11 = vadd.s32 1, %v1294_v50 }
  0x9e   :  { %v150_v12 = vor.u32 %v149_v63, %v148_v53  ;;  %vm155_vm9 = vcmp.lt.s32.totalorder %v1257_v58, 2  ;;  %v153_v13 = vor.u32 %v152_v3, %v151_v10  ;;  %vm156_vm10 = vcmp.lt.s32.totalorder %v1257_v58, 3 }
  0x9f   :  { %vm157_vm11 = vcmp.lt.s32.totalorder %v1257_v58, 4  ;;  %v162_v14 = vsel %vm154_vm7, %v141_v51, %v144_v52  ;;  %v389_v57 = vsel %vm387_vm8, %v388_v11, %v1294_v50  ;;  %v166_v0 = vsel %vm154_vm7, %v144_v52, %v147_v8 }
  0xa0   :  { %v159_v15 = vsel %vm157_vm11, %v147_v8, 2102212464  ;;  %v163_v17 = vsel %vm157_vm11, %v150_v12, 920167782  ;;  %v390_v18 = vadd.s32 %v389_v57, %v385_v6  ;;  %v158_v19 = vsel %vm154_vm7, %v138_v61, %v141_v51 }
  0xa1   :  { %v164_v20 = vsel %vm156_vm10, %v147_v8, %v163_v17  ;;  %v167_v21 = vsel %vm157_vm11, %v153_v13, 1326507024  ;;  %v160_v22 = vsel %vm156_vm10, %v144_v52, %v159_v15  ;;  %vm445_vm12 = vcmp.gt.s32.totalorder %v1266_v1, 0 }
  0xa2   :  { %v165_v23 = vsel %vm155_vm9, %v162_v14, %v164_v20  ;;  %v168_v24 = vsel %vm156_vm10, %v150_v12, %v167_v21  ;;  %v391_v25 = vadd.s32 536870912, %v390_v18  ;;  %v446_v36 = vsel %vm445_vm12, %v1266_v1, 0 }
  0xa3   :  { %v169_v27 = vsel %vm155_vm9, %v166_v0, %v168_v24  ;;  %v1317_v28 = vmul.u32.u64.low %v1259_v59, %v165_v23  ;;  %v1318_v32 = vmul.u32.u64.high %v1259_v59, %v165_v23, %v1317_v28  ;;  %v161_v39 = vsel %vm155_vm9, %v158_v19, %v160_v22 }
  0xa4   :  { %v1322_v34 = vmul.u32.u64.low %v1259_v59, %v169_v27  ;;  %v1323_v35 = vmul.u32.u64.high %v1259_v59, %v169_v27, %v1322_v34  ;;  %v392_v37 = vshrl.u32 %v391_v25, 30  ;;  %v448_v40 = vand.u32 31, %v446_v36 }
  0xa5   :  { %v229_v41 = vand.u32 2139095040, %v1253_v56  ;;  %v180_v43 = vadd.s32 1, %v1318_v32  ;;  %v442_v44 = vor.u32 8388608, %v1263_v60  ;;  %v177_v45 = vmul.u32 %v1259_v59, %v161_v39 }
  0xa6   :  { %v393_v42 = vshll.u32 %v392_v37, 30  ;;  %vm179_vm13 = vc.u32 %v1323_v35, %v1317_v28  ;;  %v449_v46 = vsub.s32 32, %v448_v40  ;;  %v226_v52 = vand.u32 2147483647, %v1253_v56 }
  0xa7   :  { %v181_v1 = vsel %vm179_vm13, %v180_v43, %v1318_v32  ;;  %v230_v58 = vshrl.u32 %v229_v41, 23  ;;  %v386_v54 = vadd.s32 %v1293_v49, %v1290_v47  ;;  %v1341_v55 = vshrl.u32 %v446_v36, 5 }
  0xa8   :  { %v1334_v50 = vsub.s32 %v390_v18, %v393_v42  ;;  %v182_v51 = vadd.s32 %v181_v1, %v177_v45  ;;  %v1343_v59 = vshll.u32 %v442_v44, 8  ;;  %v416_v61 = vsub.s32 4, %v392_v37 }
  0xa9   :  { %v452_v63 = vshrl.u32 %v1172_v2, %v449_v46  ;;  %v455_v3 = vshrl.u32 %v1173_v4, %v449_v46  ;;  %v458_v8 = vshrl.u32 %v1174_v7, %v449_v46  ;;  %v461_v10 = vshrl.u32 %v1175_v9, %v449_v46 }
  0xaa   :  { %v396_v60 = vsub.s32 0, %v1334_v50  ;;  %v183_v53 = vadd.s32 536870912, %v182_v51  ;;  %v1350_v11 = vadd.s32 4294967169, %v230_v58  ;;  %v451_v49 = vshll.u32 %v1171_v62, %v448_v40 }
  0xab   :  { %v454_v12 = vshll.u32 %v1172_v2, %v448_v40  ;;  %v1356_v13 = vand.u32 8388607, %v226_v52  ;;  %v457_v15 = vshll.u32 %v1173_v4, %v448_v40  ;;  %v460_v17 = vshll.u32 %v1174_v7, %v448_v40 }
  0xac   :  { %v1019_v6 = vmin.u32 %v396_v60, %v1334_v50  ;;  %v184_v47 = vshrl.u32 %v183_v53, 30  ;;  %v464_v0 = vshrl.u32 %v1176_v16, %v449_v46  ;;  %v417_v18 = vsel %vm332_vm14, %v416_v61, %v392_v37 }
  0xad   :  { %v453_v20 = vor.u32 %v452_v63, %v451_v49  ;;  %v456_v21 = vor.u32 %v455_v3, %v454_v12  ;;  %v459_v31 = vor.u32 %v458_v8, %v457_v15  ;;  %v462_v23 = vor.u32 %v461_v10, %v460_v17 }
  0xae   :  { %v398_v57 = vclz %v1019_v6  ;;  %v185_v19 = vshll.u32 %v184_v47, 30  ;;  %v463_v24 = vshll.u32 %v1175_v9, %v448_v40  ;;  %v208_v27 = vsub.s32 4, %v184_v47 }
  0xaf   :  { %v450_v32 = vshrl.u32 %v1171_v62, %v449_v46  ;;  %vm466_vm1 = vcmp.lt.s32.totalorder %v1341_v55, 1  ;;  %vm467_vm3 = vcmp.lt.s32.totalorder %v1341_v55, 2  ;;  %vm468_vm4 = vcmp.lt.s32.totalorder %v1341_v55, 3 }
  0xb0   :  { %v1020_v22 = vadd.s32 4294967294, %v398_v57  ;;  %v1371_v25 = vsub.s32 %v182_v51, %v185_v19  ;;  %v465_v34 = vor.u32 %v464_v0, %v463_v24  ;;  %vm1379_vm5 = vcmp.le.f32.partialorder %v122_v33, 0.7853982 }
  0xb1   :  { %vm469_vm6 = vcmp.lt.s32.totalorder %v1341_v55, 4  ;;  %v474_v40 = vsel %vm466_vm1, %v453_v20, %v456_v21  ;;  %v478_v1 = vsel %vm466_vm1, %v456_v21, %v459_v31  ;;  %v419_v53 = vsel %vm1360_vm15, 0, %v417_v18 }
  0xb2   :  { %vm1021_vm2 = vcmp.lt.s32.totalorder %v1020_v22, 0  ;;  %v188_v39 = vsub.s32 0, %v1371_v25  ;;  %v471_v43 = vsel %vm469_vm6, %v459_v31, 2102212464  ;;  %v475_v44 = vsel %vm469_vm6, %v462_v23, 920167782 }
  0xb3   :  { %v401_v36 = vsel %vm1021_vm2, 0, %v1020_v22  ;;  %v476_v33 = vsel %vm468_vm4, %v459_v31, %v475_v44  ;;  %v479_v61 = vsel %vm469_vm6, %v465_v34, 1326507024  ;;  %v472_v3 = vsel %vm468_vm4, %v456_v21, %v471_v43 }
  0xb4   :  { %v402_v41 = vsub.s32 32, %v401_v36  ;;  %v406_v42 = vsub.s32 4294967266, %v401_v36  ;;  %v403_v45 = vshll.u32 %v1334_v50, %v401_v36  ;;  %v1011_v46 = vmin.u32 %v188_v39, %v1371_v25 }
  0xb5   :  { %v477_v60 = vsel %vm467_vm3, %v474_v40, %v476_v33  ;;  %v470_v50 = vsel %vm466_vm1, %v450_v32, %v453_v20  ;;  %v480_v10 = vsel %vm468_vm4, %v462_v23, %v479_v61  ;;  %v178_v20 = vadd.s32 %v1317_v28, %v1323_v35  ;;  %v104_v28 = vpop.permute.xlu1 %103 }
  0xb6   :  { %v404_v58 = vshrl.u32 %v386_v54, %v402_v41  ;;  %v407_v51 = vadd.s32 127, %v406_v42  ;;  %v190_v63 = vclz %v1011_v46  ;;  %v209_v54 = vsel %vm124_vm0, %v208_v27, %v184_v47 }
  0xb7   :  { %v481_v12 = vsel %vm467_vm3, %v478_v1, %v480_v10  ;;  %v1408_v57 = vmul.u32.u64.low %v1343_v59, %v477_v60  ;;  %v1409_v15 = vmul.u32.u64.high %v1343_v59, %v477_v60, %v1408_v57  ;;  %v473_v0 = vsel %vm467_vm3, %v470_v50, %v472_v3 }
  0xb8   :  { %v405_v6 = vor.u32 %v404_v58, %v403_v45  ;;  %v408_v8 = vshll.u32 %v407_v51, 23  ;;  %v1012_v49 = vadd.s32 4294967294, %v190_v63  ;;  %v423_v47 = vadd.s32 3, %v419_v53 }
  0xb9   :  { %v1414_v18 = vmul.u32.u64.low %v1343_v59, %v481_v12  ;;  %v1415_v19 = vmul.u32.u64.high %v1343_v59, %v481_v12, %v1414_v18  ;;  %v236_v21 = vadd.s32 1, %v1350_v11  ;;  %v211_v24 = vsel %vm1379_vm5, 0, %v209_v54 }
  0xba   :  { %v409_v17 = vor.u32 4788187, %v408_v8  ;;  %vm1013_vm7 = vcmp.lt.s32.totalorder %v1012_v49, 0  ;;  %v412_v31 = vcvt.s32.f32 %v405_v6  ;;  %v489_v32 = vmul.u32 %v1343_v59, %v473_v0 }
  0xbb   :  { %v193_v23 = vsel %vm1013_vm7, 0, %v1012_v49  ;;  %v492_v34 = vadd.s32 1, %v1409_v15  ;;  %vm491_vm8 = vc.u32 %v1415_v19, %v1408_v57  ;;  %vm237_vm9 = vcmp.gt.s32.totalorder %v236_v21, 0 }
  0xbc   :  { %v410_v22 = vand.u32 2147483647, %v409_v17  ;;  %v194_v27 = vsub.s32 32, %v193_v23  ;;  %v198_v55 = vsub.s32 4294967266, %v193_v23  ;;  %v195_v39 = vshll.u32 %v1371_v25, %v193_v23 }
  0xbd   :  { %v493_v40 = vsel %vm491_vm8, %v492_v34, %v1409_v15  ;;  %v238_v41 = vsel %vm237_vm9, %v236_v21, 0  ;;  %v215_v43 = vadd.s32 3, %v211_v24  ;;  %v1428_v33 = vmul.f32 %v104_v28, %v1216_v5 }
  0xbe   :  { %v413_v36 = vmul.f32 %v412_v31, %v410_v22  ;;  %v196_v35 = vshrl.u32 %v178_v20, %v194_v27  ;;  %v199_v11 = vadd.s32 127, %v198_v55  ;;  %v494_v44 = vadd.s32 %v493_v40, %v489_v32 }
  0xbf   :  { %v240_v45 = vand.u32 31, %v238_v41  ;;  %v1435_v60 = vand.u32 3, %v423_v47  ;;  %v1437_v53 = vand.u32 3, %v215_v43  ;;  %vm436_vm10 = vcmp.lt.s32.totalorder %v1246_v38, 0 }
  0xc0   :  { %v414_v42 = vxor.u32 2147483648, %v413_v36  ;;  %v197_v46 = vor.u32 %v196_v35, %v195_v39  ;;  %v200_v59 = vshll.u32 %v199_v11, 23  ;;  %v495_v1 = vadd.s32 536870912, %v494_v44 }
  0xc1   :  { %v241_v58 = vsub.s32 32, %v240_v45  ;;  %v234_v50 = vor.u32 8388608, %v1356_v13  ;;  %v645_v8 = vand.u32 2139095040, %v1428_v33  ;;  %v1443_v54 = vadd.s32 %v1408_v57, %v1415_v19 }
  0xc2   :  { %v415_v25 = vsel %vm332_vm14, %v414_v42, %v413_v36  ;;  %v201_v61 = vor.u32 4788187, %v200_v59  ;;  %v496_v63 = vshrl.u32 %v495_v1, 30  ;;  %v204_v6 = vcvt.s32.f32 %v197_v46 }
  0xc3   :  { %v418_v51 = vsel %vm1360_vm15, %v1234_v29, %v415_v25  ;;  %v1445_v10 = vshrl.u32 %v238_v41, 5  ;;  %v250_v49 = vshrl.u32 %v1174_v7, %v241_v58  ;;  %v244_v15 = vshrl.u32 %v1172_v2, %v241_v58 }
  0xc4   :  { %1089 = vcosq.f32 %v418_v51  ;;  %v202_v3 = vand.u32 2147483647, %v201_v61  ;;  %v497_v14 = vshll.u32 %v496_v63, 30  ;;  %v252_v17 = vshll.u32 %v1174_v7, %v240_v45 }
  0xc5   :  { %1091 = vsinq.f32 %v418_v51  ;;  %v253_v13 = vshrl.u32 %v1175_v9, %v241_v58  ;;  %vm429_vm11 = vcmp.eq.s32.totalorder %v1435_v60, 2  ;;  %v243_v18 = vshll.u32 %v1171_v62, %v240_v45 }
  0xc6   :  { %v205_v12 = vmul.f32 %v204_v6, %v202_v3  ;;  %v1452_v0 = vsub.s32 %v494_v44, %v497_v14  ;;  %v247_v57 = vshrl.u32 %v1173_v4, %v241_v58  ;;  %v249_v19 = vshll.u32 %v1173_v4, %v240_v45 }
  0xc7   :  { %vm426_vm12 = vcmp.eq.s32.totalorder %v1435_v60, 0  ;;  %v520_v20 = vsub.s32 4, %v496_v63  ;;  %v254_v21 = vor.u32 %v253_v13, %v252_v17  ;;  %v256_v22 = vshrl.u32 %v1176_v16, %v241_v58 }
  0xc8   :  { %v206_v47 = vxor.u32 2147483648, %v205_v12  ;;  %vm425_vm13 = vcmp.lt.s32.totalorder %v1435_v60, 2  ;;  %v500_v31 = vsub.s32 0, %v1452_v0  ;;  %v246_v23 = vshll.u32 %v1172_v2, %v240_v45 }
  0xc9   :  { %v251_v24 = vor.u32 %v250_v49, %v249_v19  ;;  %v1462_v27 = vshll.u32 %v234_v50, 8  ;;  %vm422_vm14 = vweird.f32 %v1234_v29  ;;  %v242_v32 = vshrl.u32 %v1171_v62, %v241_v58 }
  0xca   :  { %v207_v55 = vsel %vm124_vm0, %v206_v47, %v205_v12  ;;  %v245_v34 = vor.u32 %v244_v15, %v243_v18  ;;  %v255_v36 = vshll.u32 %v1175_v9, %v240_v45  ;;  %v1023_v28 = vmin.u32 %v500_v31, %v1452_v0 }
  0xcb   :  { %v210_v39 = vsel %vm1379_vm5, %v1237_v30, %v207_v55  ;;  %v248_v35 = vor.u32 %v247_v57, %v246_v23  ;;  %vm261_vm15 = vcmp.lt.s32.totalorder %v1445_v10, 4  ;;  %v521_v11 = vsel %vm436_vm10, %v520_v20, %v496_v63 }
  0xcc   :  { %1093 = vcosq.f32 %v210_v39  ;;  %v257_v40 = vor.u32 %v256_v22, %v255_v36  ;;  %v267_v41 = vsel %vm261_vm15, %v254_v21, 920167782  ;;  %vm1480_vm0 = vcmp.le.f32.partialorder %v434_v48, 0.7853982 }
  0xcd   :  { %1095 = vsinq.f32 %v210_v39  ;;  %v502_v43 = vclz %v1023_v28  ;;  %vm258_vm1 = vcmp.lt.s32.totalorder %v1445_v10, 1  ;;  %v263_v44 = vsel %vm261_vm15, %v251_v24, 2102212464 }
  0xce   :  { %v1090_v42 = vpop.eup %1089  ;;  %vm259_vm2 = vcmp.lt.s32.totalorder %v1445_v10, 2  ;;  %vm260_vm3 = vcmp.lt.s32.totalorder %v1445_v10, 3  ;;  %v262_v59 = vsel %vm258_vm1, %v242_v32, %v245_v34  ;;  %v266_v58 = vsel %vm258_vm1, %v245_v34, %v248_v35 }
  0xcf   :  { %v1092_v45 = vpop.eup %1091  ;;  %v430_v46 = vxor.u32 2147483648, %v1090_v42  ;;  %v1024_v1 = vadd.s32 4294967294, %v502_v43  ;;  %v268_v48 = vsel %vm260_vm3, %v251_v24, %v267_v41  ;;  %v264_v61 = vsel %vm260_vm3, %v248_v35, %v263_v44  ;;  %v100_v44 = vpop.permute.xlu0 %99 }
  0xd0   :  { %v427_v25 = vxor.u32 2147483648, %v1092_v45  ;;  %v270_v63 = vsel %vm258_vm1, %v248_v35, %v251_v24  ;;  %v271_v50 = vsel %vm261_vm15, %v257_v40, 1326507024  ;;  %v646_v14 = vshrl.u32 %v645_v8, 23 }
  0xd1   :  { %v431_v51 = vsel %vm429_vm11, %v430_v46, %v1092_v45  ;;  %vm1025_vm4 = vcmp.lt.s32.totalorder %v1024_v1, 0  ;;  %v272_v6 = vsel %vm260_vm3, %v254_v21, %v271_v50  ;;  %v269_v15 = vsel %vm259_vm2, %v266_v58, %v268_v48 }
  0xd2   :  { %v428_v3 = vsel %vm426_vm12, %v1090_v42, %v427_v25  ;;  %v505_v12 = vsel %vm1025_vm4, 0, %v1024_v1  ;;  %v273_v17 = vsel %vm259_vm2, %v270_v63, %v272_v6  ;;  %vm214_vm5 = vweird.f32 %v1237_v30 }
  0xd3   :  { %v432_v49 = vsel %vm425_vm13, %v428_v3, %v431_v51  ;;  %v506_v18 = vsub.s32 32, %v505_v12  ;;  %v507_v57 = vshll.u32 %v1452_v0, %v505_v12  ;;  %v510_v19 = vsub.s32 4294967266, %v505_v12 }
  0xd4   :  { %v433_v13 = vsel %vm422_vm14, nan, %v432_v49  ;;  %v1507_v60 = vmul.u32.u64.low %v1462_v27, %v273_v17  ;;  %v1508_v47 = vmul.u32.u64.high %v1462_v27, %v273_v17, %v1507_v60  ;;  %v1030_v20 = vadd.s32 4294967169, %v646_v14 }
  0xd5   :  { %v956_v8 = vmul.f32 %v433_v13, %v1231_v26  ;;  %v508_v21 = vshrl.u32 %v1443_v54, %v506_v18  ;;  %v511_v22 = vadd.s32 127, %v510_v19  ;;  %vm217_vm6 = vcmp.lt.s32.totalorder %v1437_v53, 2 }
  0xd6   :  { %v1512_v31 = vmul.u32.u64.low %v1462_v27, %v269_v15  ;;  %v1513_v29 = vmul.u32.u64.high %v1462_v27, %v269_v15, %v1512_v31  ;;  %v1094_v23 = vpop.eup %1093  ;;  %vm218_vm7 = vcmp.eq.s32.totalorder %v1437_v53, 0  ;;  %v523_v0 = vsel %vm1480_vm0, 0, %v521_v11 }
  0xd7   :  { %964 = vst [vmem:[#allocation2 + $0x10] sm:$0xff] %v956_v8  ;;  %v652_v24 = vadd.s32 1, %v1030_v20  ;;  %v1096_v55 = vpop.eup %1095  ;;  %v222_v32 = vxor.u32 2147483648, %v1094_v23  ;;  %v509_v34 = vor.u32 %v508_v21, %v507_v57  ;;  %v512_v54 = vshll.u32 %v511_v22, 23 }
  0xd8   :  { %v265_v36 = vsel %vm259_vm2, %v262_v59, %v264_v61  ;;  %v219_v39 = vxor.u32 2147483648, %v1096_v55  ;;  %vm221_vm8 = vcmp.eq.s32.totalorder %v1437_v53, 2  ;;  %vm283_vm9 = vc.u32 %v1508_v47, %v1512_v31 }
  0xd9   :  { %vm653_vm11 = vcmp.gt.s32.totalorder %v652_v24, 0  ;;  %v223_v28 = vsel %vm221_vm8, %v222_v32, %v1096_v55  ;;  %v513_v35 = vor.u32 4788187, %v512_v54  ;;  %v527_v40 = vadd.s32 3, %v523_v0 }
  0xda   :  { %v284_v11 = vadd.s32 1, %v1513_v29  ;;  %v220_v41 = vsel %vm218_vm7, %v1094_v23, %v219_v39  ;;  %v281_v42 = vmul.u32 %v1462_v27, %v265_v36  ;;  %v642_v10 = vand.u32 2147483647, %v1428_v33 }
  0xdb   :  { %v654_v43 = vsel %vm653_vm11, %v652_v24, 0  ;;  %v224_v45 = vsel %vm217_vm6, %v220_v41, %v223_v28  ;;  %v514_v46 = vand.u32 2147483647, %v513_v35  ;;  %v516_v59 = vcvt.s32.f32 %v509_v34 }
  0xdc   :  { %v285_v25 = vsel %vm283_vm9, %v284_v11, %v1513_v29  ;;  %v225_v1 = vsel %vm214_vm5, nan, %v224_v45  ;;  %v656_v48 = vand.u32 31, %v654_v43  ;;  %v1536_v27 = vand.u32 3, %v527_v40 }
  0xdd   :  { %v286_v58 = vadd.s32 %v285_v25, %v281_v42  ;;  %v954_v51 = vmul.f32 %v225_v1, %v1231_v26  ;;  %v517_v61 = vmul.f32 %v516_v59, %v514_v46  ;;  %v1539_v63 = vmul.f32 %v100_v44, %v1216_v5 }
  0xde   :  { %v649_v53 = vand.u32 8388607, %v642_v10  ;;  %v655_v3 = vshrl.u32 %v654_v43, 5  ;;  %v657_v6 = vsub.s32 32, %v656_v48  ;;  %v659_v30 = vshll.u32 %v1171_v62, %v656_v48 }
  0xdf   :  { %v287_v50 = vadd.s32 536870912, %v286_v58  ;;  %962 = vst [vmem:[#allocation2] sm:$0xff] %v954_v51  ;;  %v518_v14 = vxor.u32 2147483648, %v517_v61  ;;  %v662_v49 = vshll.u32 %v1172_v2, %v656_v48  ;;  %v665_v12 = vshll.u32 %v1173_v4, %v656_v48 }
  0xe0   :  { %v660_v17 = vshrl.u32 %v1172_v2, %v657_v6  ;;  %v663_v5 = vshrl.u32 %v1173_v4, %v657_v6  ;;  %v668_v13 = vshll.u32 %v1174_v7, %v656_v48  ;;  %v666_v57 = vshrl.u32 %v1174_v7, %v657_v6 }
  0xe1   :  { %v1546_v15 = vshrl.u32 %v287_v50, 30  ;;  %v519_v18 = vsel %vm436_vm10, %v518_v14, %v517_v61  ;;  %v669_v19 = vshrl.u32 %v1175_v9, %v657_v6  ;;  %v672_v8 = vshrl.u32 %v1176_v16, %v657_v6 }
  0xe2   :  { %v522_v60 = vsel %vm1480_vm0, %v1246_v38, %v519_v18  ;;  %v661_v21 = vor.u32 %v660_v17, %v659_v30  ;;  %v671_v22 = vshll.u32 %v1175_v9, %v656_v48  ;;  %v664_v29 = vor.u32 %v663_v5, %v662_v49 }
  0xe3   :  { %v289_v20 = vshll.u32 %v1546_v15, 30  ;;  %1097 = vcosq.f32 %v522_v60  ;;  %v667_v23 = vor.u32 %v666_v57, %v665_v12  ;;  %v670_v0 = vor.u32 %v669_v19, %v668_v13 }
  0xe4   :  { %1099 = vsinq.f32 %v522_v60  ;;  %v650_v55 = vor.u32 8388608, %v649_v53  ;;  %v673_v32 = vor.u32 %v672_v8, %v671_v22  ;;  %v658_v34 = vshrl.u32 %v1171_v62, %v657_v6 }
  0xe5   :  { %v1561_v24 = vsub.s32 %v286_v58, %v289_v20  ;;  %vm674_vm10 = vcmp.lt.s32.totalorder %v655_v3, 1  ;;  %vm677_vm12 = vcmp.lt.s32.totalorder %v655_v3, 4  ;;  %v541_v37 = vand.u32 2139095040, %v1539_v63 }
  0xe6   :  { %vm676_vm13 = vcmp.lt.s32.totalorder %v655_v3, 3  ;;  %v679_v36 = vsel %vm677_vm12, %v667_v23, 2102212464  ;;  %v682_v39 = vsel %vm674_vm10, %v661_v21, %v664_v29  ;;  %v678_v28 = vsel %vm674_vm10, %v658_v34, %v661_v21 }
  0xe7   :  { %v292_v54 = vsub.s32 0, %v1561_v24  ;;  %v680_v35 = vsel %vm676_vm13, %v664_v29, %v679_v36  ;;  %v683_v40 = vsel %vm677_vm12, %v670_v0, 920167782  ;;  %v687_v11 = vsel %vm677_vm12, %v673_v32, 1326507024 }
  0xe8   :  { %vm675_vm14 = vcmp.lt.s32.totalorder %v655_v3, 2  ;;  %v684_v42 = vsel %vm676_vm13, %v667_v23, %v683_v40  ;;  %v686_v43 = vsel %vm674_vm10, %v664_v29, %v667_v23  ;;  %v688_v45 = vsel %vm676_vm13, %v670_v0, %v687_v11 }
  0xe9   :  { %v1015_v41 = vmin.u32 %v292_v54, %v1561_v24  ;;  %v685_v44 = vsel %vm675_vm14, %v682_v39, %v684_v42  ;;  %v690_v46 = vshll.u32 %v650_v55, 8  ;;  %v542_v59 = vshrl.u32 %v541_v37, 23 }
  0xea   :  { %vm526_vm15 = vweird.f32 %v1246_v38  ;;  %vm529_vm0 = vcmp.lt.s32.totalorder %v1536_v27, 2  ;;  %vm228_vm1 = vcmp.lt.s32.totalorder %v1253_v56, 0  ;;  %v681_v1 = vsel %vm675_vm14, %v678_v28, %v680_v35 }
  0xeb   :  { %v294_v25 = vclz %v1015_v41  ;;  %v689_v58 = vsel %vm675_vm14, %v686_v43, %v688_v45  ;;  %v1570_v48 = vmul.u32.u64.low %v690_v46, %v685_v44  ;;  %v1571_v51 = vmul.u32.u64.high %v690_v46, %v685_v44, %v1570_v48 }
  0xec   :  { %v1026_v61 = vadd.s32 4294967169, %v542_v59  ;;  %v1574_v53 = vmul.u32.u64.low %v690_v46, %v689_v58  ;;  %v1575_v3 = vmul.u32.u64.high %v690_v46, %v689_v58, %v1574_v53  ;;  %v538_v6 = vand.u32 2147483647, %v1539_v63 }
  0xed   :  { %v1016_v50 = vadd.s32 4294967294, %v294_v25  ;;  %v1098_v14 = vpop.eup %1097  ;;  %vm530_vm2 = vcmp.eq.s32.totalorder %v1536_v27, 0  ;;  %vm533_vm3 = vcmp.eq.s32.totalorder %v1536_v27, 2  ;;  %v282_v30 = vadd.s32 %v1512_v31, %v1508_v47 }
  0xee   :  { %v548_v49 = vadd.s32 1, %v1026_v61  ;;  %v1100_v12 = vpop.eup %1099  ;;  %v534_v17 = vxor.u32 2147483648, %v1098_v14  ;;  %v312_v5 = vsub.s32 4, %v1546_v15  ;;  %v697_v13 = vmul.u32 %v690_v46, %v681_v1  ;;  %v112_v61 = vpop.permute.xlu1 %111 }
  0xef   :  { %vm1017_vm4 = vcmp.lt.s32.totalorder %v1016_v50, 0  ;;  %v531_v18 = vxor.u32 2147483648, %v1100_v12  ;;  %v700_v19 = vadd.s32 1, %v1571_v51  ;;  %v1586_v21 = vand.u32 8388607, %v538_v6 }
  0xf0   :  { %v297_v57 = vsel %vm1017_vm4, 0, %v1016_v50  ;;  %vm549_vm5 = vcmp.gt.s32.totalorder %v548_v49, 0  ;;  %v535_v8 = vsel %vm533_vm3, %v534_v17, %v1100_v12  ;;  %vm699_vm6 = vc.u32 %v1575_v3, %v1570_v48 }
  0xf1   :  { %v298_v60 = vsub.s32 32, %v297_v57  ;;  %v302_v20 = vsub.s32 4294967266, %v297_v57  ;;  %v532_v47 = vsel %vm530_vm2, %v1098_v14, %v531_v18  ;;  %v299_v31 = vshll.u32 %v1561_v24, %v297_v57 }
  0xf2   :  { %v550_v22 = vsel %vm549_vm5, %v548_v49, 0  ;;  %v536_v29 = vsel %vm529_vm0, %v532_v47, %v535_v8  ;;  %v701_v55 = vsel %vm699_vm6, %v700_v19, %v1571_v51  ;;  %v313_v34 = vsel %vm228_vm1, %v312_v5, %v1546_v15 }
  0xf3   :  { %v300_v23 = vshrl.u32 %v282_v30, %v298_v60  ;;  %v303_v0 = vadd.s32 127, %v302_v20  ;;  %v537_v32 = vsel %vm526_vm15, nan, %v536_v29  ;;  %v702_v37 = vadd.s32 %v701_v55, %v697_v13 }
  0xf4   :  { %v552_v24 = vand.u32 31, %v550_v22  ;;  %v957_v54 = vmul.f32 %v537_v32, %v1231_v26  ;;  %vm1604_vm7 = vcmp.le.f32.partialorder %v226_v52, 0.7853982  ;;  %v546_v15 = vor.u32 8388608, %v1586_v21 }
  0xf5   :  { %v301_v36 = vor.u32 %v300_v23, %v299_v31  ;;  %v304_v39 = vshll.u32 %v303_v0, 23  ;;  %v703_v28 = vadd.s32 536870912, %v702_v37  ;;  %v315_v40 = vsel %vm1604_vm7, 0, %v313_v34 }
  0xf6   :  { %v553_v35 = vsub.s32 32, %v552_v24  ;;  %965 = vst [vmem:[#allocation2 + $0x18] sm:$0xff] %v957_v54  ;;  %v1611_v11 = vshrl.u32 %v550_v22, 5  ;;  %v564_v46 = vshll.u32 %v1174_v7, %v552_v24  ;;  %v555_v1 = vshll.u32 %v1171_v62, %v552_v24 }
  0xf7   :  { %v305_v38 = vor.u32 4788187, %v304_v39  ;;  %v308_v41 = vcvt.s32.f32 %v301_v36  ;;  %v1613_v42 = vshrl.u32 %v703_v28, 30  ;;  %v558_v58 = vshll.u32 %v1172_v2, %v552_v24 }
  0xf8   :  { %v556_v43 = vshrl.u32 %v1172_v2, %v553_v35  ;;  %v559_v52 = vshrl.u32 %v1173_v4, %v553_v35  ;;  %v562_v45 = vshrl.u32 %v1174_v7, %v553_v35  ;;  %v565_v59 = vshrl.u32 %v1175_v9, %v553_v35 }
  0xf9   :  { %v306_v44 = vand.u32 2147483647, %v305_v38  ;;  %v705_v25 = vshll.u32 %v1613_v42, 30  ;;  %v561_v51 = vshll.u32 %v1173_v4, %v552_v24 }
  0xfa   :  { %1133 = shalt.err (!%p1130_p4)
}
  0xfb   :  { %s1134_s7 = scalar_lea.hbm %s1874_s3, 128 }
  0xfc   :  { %p1135_p5 = scmp.ne.s32.totalorder %s1874_s3, %s1134_s7  ;;  %p1138_p6 = scmp.lt.u32.totalorder %s1134_s7, %s1874_s3 }
  0xfe   :  { %p1140_p7 = pnand %p1138_p6, %p1135_p5 }
 0x100   :  { %1143 = shalt.err (!%p1140_p7)
}
 0x101   :  { %992 = dma.vmem_to_hbm [thread:$0]  %s990_s30, 128, %s1874_s3, [#allocation5]   ;;  %v309_v50 = vmul.f32 %v308_v41, %v306_v44  ;;  %v566_v53 = vor.u32 %v565_v59, %v564_v46  ;;  %v568_v14 = vshrl.u32 %v1176_v16, %v553_v35  ;;  %v1637_v30 = vsub.s32 %v702_v37, %v705_v25  ;;  %v1121_v57 = vld [vmem:[%s1871_s0] sm:$0xff] }
 0x102   :  { %v557_v49 = vor.u32 %v556_v43, %v555_v1  ;;  %v560_v12 = vor.u32 %v559_v52, %v558_v58  ;;  %v563_v17 = vor.u32 %v562_v45, %v561_v51  ;;  %v319_v13 = vadd.s32 3, %v315_v40  ;;  %v108_v51 = vpop.permute.xlu0 %107  ;;  %s1178_s0 = smov [#allocation2]  }
 0x103   :  { %v310_v5 = vxor.u32 2147483648, %v309_v50  ;;  %v567_v18 = vshll.u32 %v1175_v9, %v552_v24  ;;  %v1643_v19 = vmul.f32 %v1121_v57, %v112_v61  ;;  %v708_v8 = vsub.s32 0, %v1637_v30  ;;  %s976_s3 = sshll.u32 %s1178_s0, 4  ;;  %s977_s3 = int_to_ptr.vmem [resolvable:$true] %s976_s3 }
 0x104   :  { %vm570_vm8 = vcmp.lt.s32.totalorder %v1611_v11, 1  ;;  %vm573_vm9 = vcmp.lt.s32.totalorder %v1611_v11, 4  ;;  %v586_v60 = vshll.u32 %v546_v15, 8  ;;  %vm572_vm11 = vcmp.lt.s32.totalorder %v1611_v11, 3  ;;  %s1144_s16 = scalar_lea.vmem %s977_s3, 1024  ;;  %p1149_p9 = scmp.lt.s32.totalorder %s977_s3, %s977_s3 }
 0x105   :  { %v311_v20 = vsel %vm228_vm1, %v310_v5, %v309_v50  ;;  %v569_v21 = vor.u32 %v568_v14, %v567_v18  ;;  %v579_v47 = vsel %vm573_vm9, %v566_v53, 920167782  ;;  %v1031_v22 = vmin.u32 %v708_v8, %v1637_v30  ;;  %p1145_p8 = scmp.ne.s32.totalorder %s977_s3, %s1144_s16  ;;  %p1150_p10 = scmp.lt.s32.totalorder %s1144_s16, %s1144_s16 }
 0x106   :  { %v314_v31 = vsel %vm1604_vm7, %v1253_v56, %v311_v20  ;;  %v575_v29 = vsel %vm573_vm9, %v563_v17, 2102212464  ;;  %v578_v23 = vsel %vm570_vm8, %v557_v49, %v560_v12  ;;  %v728_v0 = vsub.s32 4, %v1613_v42 }
 0x107   :  { %1101 = vcosq.f32 %v314_v31  ;;  %v554_v55 = vshrl.u32 %v1171_v62, %v553_v35  ;;  %v580_v32 = vsel %vm572_vm11, %v563_v17, %v579_v47  ;;  %v710_v34 = vclz %v1031_v22  ;;  %p1151_p11 = por %p1150_p10, %p1149_p9 }
 0x108   :  { %1103 = vsinq.f32 %v314_v31  ;;  %vm571_vm10 = vcmp.lt.s32.totalorder %v1611_v11, 2  ;;  %v582_v37 = vsel %vm570_vm8, %v560_v12, %v563_v17  ;;  %v576_v54 = vsel %vm572_vm11, %v560_v12, %v575_v29 }
 0x109   :  { %v574_v24 = vsel %vm570_vm8, %v554_v55, %v557_v49  ;;  %v581_v36 = vsel %vm571_vm10, %v578_v23, %v580_v32  ;;  %v583_v39 = vsel %vm573_vm9, %v569_v21, 1326507024  ;;  %v1032_v27 = vadd.s32 4294967294, %v710_v34  ;;  %p1152_p12 = pnand %p1151_p11, %p1145_p8 }
 0x10a   :  { %v584_v28 = vsel %vm572_vm11, %v566_v53, %v583_v39  ;;  %v1676_v35 = vmul.u32.u64.low %v586_v60, %v581_v36  ;;  %v1677_v38 = vmul.u32.u64.high %v586_v60, %v581_v36, %v1676_v35  ;;  %v320_v40 = vand.u32 3, %v319_v13 }
 0x10b   :  { %v585_v15 = vsel %vm571_vm10, %v582_v37, %v584_v28  ;;  %v853_v41 = vand.u32 2139095040, %v1643_v19  ;;  %vm1033_vm12 = vcmp.lt.s32.totalorder %v1032_v27, 0  ;;  %v577_v43 = vsel %vm571_vm10, %v574_v24, %v576_v54 }
 0x10c   :  { %v1681_v52 = vmul.u32.u64.low %v586_v60, %v585_v15  ;;  %v1682_v44 = vmul.u32.u64.high %v586_v60, %v585_v15, %v1681_v52  ;;  %vm644_vm13 = vcmp.lt.s32.totalorder %v1428_v33, 0  ;;  %v698_v45 = vadd.s32 %v1570_v48, %v1575_v3 }
 0x10d   :  { %v713_v11 = vsel %vm1033_vm12, 0, %v1032_v27  ;;  %v854_v46 = vshrl.u32 %v853_v41, 23  ;;  %vm318_vm14 = vweird.f32 %v1253_v56  ;;  %v729_v1 = vsel %vm644_vm13, %v728_v0, %v1613_v42 }
 0x10e   :  { %v714_v59 = vsub.s32 32, %v713_v11  ;;  %v718_v25 = vsub.s32 4294967266, %v713_v11  ;;  %v596_v58 = vadd.s32 1, %v1677_v38  ;;  %vm321_vm15 = vcmp.lt.s32.totalorder %v320_v40, 2 }
 0x10f   :  { %vm1694_vm0 = vcmp.le.f32.partialorder %v642_v10, 0.7853982  ;;  %v593_v48 = vmul.u32 %v586_v60, %v577_v43  ;;  %v1038_v3 = vadd.s32 4294967169, %v854_v46  ;;  %v715_v50 = vshll.u32 %v1637_v30, %v713_v11 }
 0x110   :  { %v716_v53 = vshrl.u32 %v698_v45, %v714_v59  ;;  %v719_v14 = vadd.s32 127, %v718_v25  ;;  %vm595_vm1 = vc.u32 %v1682_v44, %v1676_v35  ;;  %v731_v49 = vsel %vm1694_vm0, 0, %v729_v1 }
 0x111   :  { %v1102_v42 = vpop.eup %1101  ;;  %v597_v12 = vsel %vm595_vm1, %v596_v58, %v1677_v38  ;;  %v860_v17 = vadd.s32 1, %v1038_v3  ;;  %v1704_v10 = vmul.f32 %v1121_v57, %v108_v51  ;;  %vm322_vm2 = vcmp.eq.s32.totalorder %v320_v40, 0 }
 0x112   :  { %v1104_v5 = vpop.eup %1103  ;;  %v326_v13 = vxor.u32 2147483648, %v1102_v42  ;;  %v717_v18 = vor.u32 %v716_v53, %v715_v50  ;;  %v720_v8 = vshll.u32 %v719_v14, 23  ;;  %v598_v60 = vadd.s32 %v597_v12, %v593_v48 }
 0x113   :  { %v323_v30 = vxor.u32 2147483648, %v1104_v5  ;;  %vm325_vm3 = vcmp.eq.s32.totalorder %v320_v40, 2  ;;  %vm861_vm4 = vcmp.gt.s32.totalorder %v860_v17, 0  ;;  %v735_v47 = vadd.s32 3, %v731_v49 }
 0x114   :  { %v327_v20 = vsel %vm325_vm3, %v326_v13, %v1104_v5  ;;  %v721_v21 = vor.u32 4788187, %v720_v8  ;;  %v599_v31 = vadd.s32 536870912, %v598_v60  ;;  %v850_v29 = vand.u32 2147483647, %v1643_v19 }
 0x115   :  { %v324_v22 = vsel %vm322_vm2, %v1102_v42, %v323_v30  ;;  %v862_v23 = vsel %vm861_vm4, %v860_v17, 0  ;;  %v749_v57 = vand.u32 2139095040, %v1704_v10  ;;  %v724_v32 = vcvt.s32.f32 %v717_v18 }
 0x116   :  { %v328_v0 = vsel %vm321_vm15, %v324_v22, %v327_v20  ;;  %v722_v55 = vand.u32 2147483647, %v721_v21  ;;  %v1709_v34 = vshrl.u32 %v599_v31, 30  ;;  %v864_v24 = vand.u32 31, %v862_v23 }
 0x117   :  { %v329_v37 = vsel %vm318_vm14, nan, %v328_v0  ;;  %v1715_v27 = vand.u32 3, %v735_v47  ;;  %v857_v28 = vand.u32 8388607, %v850_v29  ;;  %v1721_v41 = vshrl.u32 %v862_v23, 5 }
 0x118   :  { %v955_v54 = vmul.f32 %v329_v37, %v1231_v26  ;;  %v725_v36 = vmul.f32 %v724_v32, %v722_v55  ;;  %v601_v39 = vshll.u32 %v1709_v34, 30  ;;  %v865_v38 = vsub.s32 32, %v864_v24 }
 0x119   :  { %v750_v56 = vshrl.u32 %v749_v57, 23  ;;  %v867_v43 = vshll.u32 %v1171_v62, %v864_v24  ;;  %v870_v45 = vshll.u32 %v1172_v2, %v864_v24  ;;  %v873_v25 = vshll.u32 %v1173_v4, %v864_v24 }
 0x11a   :  { %963 = vst [vmem:[#allocation2 + $0x8] sm:$0xff] %v955_v54  ;;  %v726_v40 = vxor.u32 2147483648, %v725_v36  ;;  %v1719_v15 = vsub.s32 %v598_v60, %v601_v39  ;;  %v868_v52 = vshrl.u32 %v1172_v2, %v865_v38  ;;  %v871_v11 = vshrl.u32 %v1173_v4, %v865_v38 }
 0x11b   :  { %v874_v1 = vshrl.u32 %v1174_v7, %v865_v38  ;;  %v876_v48 = vshll.u32 %v1174_v7, %v864_v24  ;;  %v877_v3 = vshrl.u32 %v1175_v9, %v865_v38  ;;  %v879_v49 = vshll.u32 %v1175_v9, %v864_v24 }
 0x11c   :  { %v727_v46 = vsel %vm644_vm13, %v726_v40, %v725_v36  ;;  %v604_v59 = vsub.s32 0, %v1719_v15  ;;  %v869_v51 = vor.u32 %v868_v52, %v867_v43  ;;  %v872_v53 = vor.u32 %v871_v11, %v870_v45 }
 0x11d   :  { %v730_v58 = vsel %vm1694_vm0, %v1428_v33, %v727_v46  ;;  %v875_v14 = vor.u32 %v874_v1, %v873_v25  ;;  %v878_v42 = vor.u32 %v877_v3, %v876_v48  ;;  %v880_v12 = vshrl.u32 %v1176_v16, %v865_v38 }
 0x11e   :  { %1105 = vcosq.f32 %v730_v58  ;;  %v1027_v50 = vmin.u32 %v604_v59, %v1719_v15  ;;  %v594_v61 = vadd.s32 %v1676_v35, %v1682_v44  ;;  %v858_v5 = vor.u32 8388608, %v857_v28 }
 0x11f   :  { %1107 = vsinq.f32 %v730_v58  ;;  %v866_v13 = vshrl.u32 %v1171_v62, %v865_v38  ;;  %v881_v18 = vor.u32 %v880_v12, %v879_v49  ;;  %vm882_vm5 = vcmp.lt.s32.totalorder %v1721_v41, 1 }
 0x120   :  { %v606_v17 = vclz %v1027_v50  ;;  %v1034_v8 = vadd.s32 4294967169, %v750_v56  ;;  %vm884_vm6 = vcmp.lt.s32.totalorder %v1721_v41, 3  ;;  %vm885_vm7 = vcmp.lt.s32.totalorder %v1721_v41, 4 }
 0x121   :  { %v890_v30 = vsel %vm882_vm5, %v869_v51, %v872_v53  ;;  %vm738_vm8 = vcmp.eq.s32.totalorder %v1715_v27, 0  ;;  %v887_v20 = vsel %vm885_vm7, %v875_v14, 2102212464  ;;  %v891_v35 = vsel %vm885_vm7, %v878_v42, 920167782 }
 0x122   :  { %v1028_v60 = vadd.s32 4294967294, %v606_v17  ;;  %v894_v44 = vsel %vm882_vm5, %v872_v53, %v875_v14  ;;  %v895_v21 = vsel %vm885_vm7, %v881_v18, 1326507024  ;;  %vm737_vm9 = vcmp.lt.s32.totalorder %v1715_v27, 2 }
 0x123   :  { %vm540_vm11 = vcmp.lt.s32.totalorder %v1539_v63, 0  ;;  %vm883_vm12 = vcmp.lt.s32.totalorder %v1721_v41, 2  ;;  %v892_v47 = vsel %vm884_vm6, %v875_v14, %v891_v35  ;;  %v896_v31 = vsel %vm884_vm6, %v878_v42, %v895_v21 }
 0x124   :  { %vm1029_vm10 = vcmp.lt.s32.totalorder %v1028_v60, 0  ;;  %vm734_vm13 = vweird.f32 %v1428_v33  ;;  %v893_v23 = vsel %vm883_vm12, %v890_v30, %v892_v47  ;;  %v897_v57 = vsel %vm883_vm12, %v894_v44, %v896_v31 }
 0x125   :  { %v609_v22 = vsel %vm1029_vm10, 0, %v1028_v60  ;;  %v898_v0 = vshll.u32 %v858_v5, 8  ;;  %v886_v37 = vsel %vm882_vm5, %v866_v13, %v869_v51  ;;  %v888_v24 = vsel %vm884_vm6, %v872_v53, %v887_v20 }
 0x126   :  { %v610_v55 = vsub.s32 32, %v609_v22  ;;  %v614_v32 = vsub.s32 4294967266, %v609_v22  ;;  %v611_v40 = vshll.u32 %v1719_v15, %v609_v22  ;;  %v756_v52 = vadd.s32 1, %v1034_v8 }
 0x127   :  { %v1767_v54 = vmul.u32.u64.low %v898_v0, %v897_v57  ;;  %v1768_v36 = vmul.u32.u64.high %v898_v0, %v897_v57, %v1767_v54  ;;  %v1770_v39 = vmul.u32.u64.low %v898_v0, %v893_v23  ;;  %v1771_v28 = vmul.u32.u64.high %v898_v0, %v893_v23, %v1770_v39 }
 0x128   :  { %v1106_v38 = vpop.eup %1105  ;;  %v612_v56 = vshrl.u32 %v594_v61, %v610_v55  ;;  %v615_v43 = vadd.s32 127, %v614_v32  ;;  %vm741_vm14 = vcmp.eq.s32.totalorder %v1715_v27, 2  ;;  %v624_v46 = vsub.s32 4, %v1709_v34 }
 0x129   :  { %v1108_v45 = vpop.eup %1107  ;;  %v742_v11 = vxor.u32 2147483648, %v1106_v38  ;;  %v889_v59 = vsel %vm883_vm12, %v886_v37, %v888_v24  ;;  %vm757_vm15 = vcmp.gt.s32.totalorder %v756_v52, 0  ;;  %vm907_vm0 = vc.u32 %v1768_v36, %v1770_v39 }
 0x12a   :  { %v739_v25 = vxor.u32 2147483648, %v1108_v45  ;;  %v613_v1 = vor.u32 %v612_v56, %v611_v40  ;;  %v616_v58 = vshll.u32 %v615_v43, 23  ;;  %v908_v15 = vadd.s32 1, %v1771_v28 }
 0x12b   :  { %v743_v51 = vsel %vm741_vm14, %v742_v11, %v1108_v45  ;;  %v746_v48 = vand.u32 2147483647, %v1704_v10  ;;  %v905_v53 = vmul.u32 %v898_v0, %v889_v59  ;;  %v758_v14 = vsel %vm757_vm15, %v756_v52, 0 }
 0x12c   :  { %v740_v3 = vsel %vm738_vm8, %v1106_v38, %v739_v25  ;;  %v617_v50 = vor.u32 4788187, %v616_v58  ;;  %v625_v42 = vsel %vm540_vm11, %v624_v46, %v1709_v34  ;;  %v909_v49 = vsel %vm907_vm0, %v908_v15, %v1771_v28 }
 0x12d   :  { %v744_v41 = vsel %vm737_vm9, %v740_v3, %v743_v51  ;;  %v760_v12 = vand.u32 31, %v758_v14  ;;  %v620_v5 = vcvt.s32.f32 %v613_v1  ;;  %v910_v13 = vadd.s32 %v909_v49, %v905_v53 }
 0x12e   :  { %v745_v61 = vsel %vm734_vm13, nan, %v744_v41  ;;  %v618_v17 = vand.u32 2147483647, %v617_v50  ;;  %vm1796_vm1 = vcmp.le.f32.partialorder %v538_v6, 0.7853982  ;;  %v759_v20 = vshrl.u32 %v758_v14, 5 }
 0x12f   :  { %v959_v18 = vmul.f32 %v745_v61, %v1231_v26  ;;  %v753_v34 = vand.u32 8388607, %v746_v48  ;;  %v761_v8 = vsub.s32 32, %v760_v12  ;;  %v627_v33 = vsel %vm1796_vm1, 0, %v625_v42 }
 0x130   :  { %v621_v60 = vmul.f32 %v620_v5, %v618_v17  ;;  %v911_v30 = vadd.s32 536870912, %v910_v13  ;;  %v763_v35 = vshll.u32 %v1171_v62, %v760_v12  ;;  %v766_v6 = vshll.u32 %v1172_v2, %v760_v12 }
 0x131   :  { %967 = vst [vmem:[#allocation2 + $0x28] sm:$0xff] %v959_v18  ;;  %v764_v44 = vshrl.u32 %v1172_v2, %v761_v8  ;;  %v767_v21 = vshrl.u32 %v1173_v4, %v761_v8  ;;  %v770_v22 = vshrl.u32 %v1174_v7, %v761_v8  ;;  %v773_v23 = vshrl.u32 %v1175_v9, %v761_v8 }
 0x132   :  { %v622_v47 = vxor.u32 2147483648, %v621_v60  ;;  %v1808_v31 = vshrl.u32 %v911_v30, 30  ;;  %v769_v57 = vshll.u32 %v1173_v4, %v760_v12  ;;  %v772_v0 = vshll.u32 %v1174_v7, %v760_v12 }
 0x133   :  { %v775_v55 = vshll.u32 %v1175_v9, %v760_v12  ;;  %v776_v32 = vshrl.u32 %v1176_v16, %v761_v8  ;;  %v765_v24 = vor.u32 %v764_v44, %v763_v35  ;;  %v768_v54 = vor.u32 %v767_v21, %v766_v6 }
 0x134   :  { %v623_v2 = vsel %vm540_vm11, %v622_v47, %v621_v60  ;;  %v913_v37 = vshll.u32 %v1808_v31, 30  ;;  %v774_v38 = vor.u32 %v773_v23, %v772_v0  ;;  %v771_v7 = vor.u32 %v770_v22, %v769_v57 }
 0x135   :  { %v626_v28 = vsel %vm1796_vm1, %v1539_v63, %v623_v2  ;;  %v777_v40 = vor.u32 %v776_v32, %v775_v55  ;;  %v631_v9 = vadd.s32 3, %v627_v33  ;;  %v754_v56 = vor.u32 8388608, %v753_v34 }
 0x136   :  { %1109 = vcosq.f32 %v626_v28  ;;  %v914_v4 = vsub.s32 %v910_v13, %v913_v37  ;;  %vm778_vm2 = vcmp.lt.s32.totalorder %v759_v20, 1  ;;  %v762_v43 = vshrl.u32 %v1171_v62, %v761_v8 }
 0x137   :  { %1111 = vsinq.f32 %v626_v28  ;;  %vm781_vm3 = vcmp.lt.s32.totalorder %v759_v20, 4  ;;  %v786_v52 = vsel %vm778_vm2, %v765_v24, %v768_v54  ;;  %vm779_vm4 = vcmp.lt.s32.totalorder %v759_v20, 2 }
 0x138   :  { %v916_v16 = vsub.s32 0, %v914_v4  ;;  %vm780_vm5 = vcmp.lt.s32.totalorder %v759_v20, 3  ;;  %v787_v45 = vsel %vm781_vm3, %v774_v38, 920167782  ;;  %v791_v11 = vsel %vm781_vm3, %v777_v40, 1326507024 }
 0x139   :  { %v783_v59 = vsel %vm781_vm3, %v771_v7, 2102212464  ;;  %v788_v25 = vsel %vm780_vm5, %v771_v7, %v787_v45  ;;  %v790_v1 = vsel %vm778_vm2, %v768_v54, %v771_v7  ;;  %v792_v51 = vsel %vm780_vm5, %v774_v38, %v791_v11 }
 0x13a   :  { %v1039_v46 = vmin.u32 %v916_v16, %v914_v4  ;;  %v789_v58 = vsel %vm779_vm4, %v786_v52, %v788_v25  ;;  %v794_v15 = vshll.u32 %v754_v56, 8  ;;  %v632_v3 = vand.u32 3, %v631_v9 }
 0x13b   :  { %v782_v62 = vsel %vm778_vm2, %v762_v43, %v765_v24  ;;  %v784_v53 = vsel %vm780_vm5, %v768_v54, %v783_v59  ;;  %v793_v14 = vsel %vm779_vm4, %v790_v1, %v792_v51  ;;  %v906_v60 = vadd.s32 %v1770_v39, %v1768_v36 }
 0x13c   :  { %v918_v50 = vclz %v1039_v46  ;;  %v1828_v41 = vmul.u32.u64.low %v794_v15, %v789_v58  ;;  %v1829_v42 = vmul.u32.u64.high %v794_v15, %v789_v58, %v1828_v41  ;;  %vm633_vm6 = vcmp.lt.s32.totalorder %v632_v3, 2 }
 0x13d   :  { %v1831_v12 = vmul.u32.u64.low %v794_v15, %v793_v14  ;;  %v1832_v61 = vmul.u32.u64.high %v794_v15, %v793_v14, %v1831_v12  ;;  %vm634_vm7 = vcmp.eq.s32.totalorder %v632_v3, 0  ;;  %v785_v5 = vsel %vm779_vm4, %v782_v62, %v784_v53 }
 0x13e   :  { %v1040_v49 = vadd.s32 4294967294, %v918_v50  ;;  %vm637_vm9 = vcmp.eq.s32.totalorder %v632_v3, 2  ;;  %v804_v34 = vadd.s32 1, %v1829_v42  ;;  %v801_v6 = vmul.u32 %v794_v15, %v785_v5 }
 0x13f   :  { %vm803_vm11 = vc.u32 %v1832_v61, %v1828_v41  ;;  %vm630_vm10 = vweird.f32 %v1539_v63  ;;  %v936_v40 = vsub.s32 4, %v1808_v31  ;;  %vm852_vm12 = vcmp.lt.s32.totalorder %v1643_v19, 0 }
 0x140   :  { %v1110_v17 = vpop.eup %1109  ;;  %vm1041_vm8 = vcmp.lt.s32.totalorder %v1040_v49, 0  ;;  %v805_v22 = vsel %vm803_vm11, %v804_v34, %v1829_v42  ;;  %vm851_vm13 = vcmp.le.f32.partialorder %v850_v29, 0.7853982  ;;  %v802_v25 = vadd.s32 %v1828_v41, %v1832_v61 }
 0x141   :  { %v1112_v13 = vpop.eup %1111  ;;  %v638_v18 = vxor.u32 2147483648, %v1110_v17  ;;  %v921_v27 = vsel %vm1041_vm8, 0, %v1040_v49  ;;  %v806_v57 = vadd.s32 %v805_v22, %v801_v6  ;;  %v937_v56 = vsel %vm852_vm12, %v936_v40, %v1808_v31 }
 0x142   :  { %v635_v8 = vxor.u32 2147483648, %v1112_v13  ;;  %v922_v33 = vsub.s32 32, %v921_v27  ;;  %v926_v30 = vsub.s32 4294967266, %v921_v27  ;;  %v923_v44 = vshll.u32 %v914_v4, %v921_v27 }
 0x143   :  { %v639_v35 = vsel %vm637_vm9, %v638_v18, %v1112_v13  ;;  %v807_v32 = vadd.s32 536870912, %v806_v57  ;;  %v939_v52 = vsel %vm851_vm13, 0, %v937_v56  ;;  %vm942_vm2 = vweird.f32 %v1643_v19 }
 0x144   :  { %v636_v20 = vsel %vm634_vm7, %v1110_v17, %v635_v8  ;;  %v924_v21 = vshrl.u32 %v906_v60, %v922_v33  ;;  %v927_v47 = vadd.s32 127, %v926_v30  ;;  %v943_v46 = vadd.s32 3, %v939_v52 }
 0x145   :  { %v640_v23 = vsel %vm633_vm6, %v636_v20, %v639_v35  ;;  %v808_v37 = vshrl.u32 %v807_v32, 30  ;;  %vm748_vm3 = vcmp.lt.s32.totalorder %v1704_v10, 0  ;;  %vm747_vm4 = vcmp.le.f32.partialorder %v746_v48, 0.7853982 }
 0x146   :  { %v641_v0 = vsel %vm630_vm10, nan, %v640_v23  ;;  %v925_v36 = vor.u32 %v924_v21, %v923_v44  ;;  %v928_v39 = vshll.u32 %v927_v47, 23  ;;  %v944_v51 = vand.u32 3, %v943_v46 }
 0x147   :  { %v958_v55 = vmul.f32 %v641_v0, %v1231_v26  ;;  %v809_v28 = vshll.u32 %v808_v37, 30  ;;  %v832_v34 = vsub.s32 4, %v808_v37  ;;  %vm838_vm8 = vweird.f32 %v1704_v10 }
 0x148   :  { %v929_v2 = vor.u32 4788187, %v928_v39  ;;  %v932_v54 = vcvt.s32.f32 %v925_v36  ;;  %vm949_vm15 = vcmp.eq.s32.totalorder %v944_v51, 2  ;;  %vm946_vm0 = vcmp.eq.s32.totalorder %v944_v51, 0 }
 0x149   :  { %966 = vst [vmem:[#allocation2 + $0x20] sm:$0xff] %v958_v55  ;;  %v810_v4 = vsub.s32 %v806_v57, %v809_v28  ;;  %vm945_vm1 = vcmp.lt.s32.totalorder %v944_v51, 2  ;;  %v833_v33 = vsel %vm748_vm3, %v832_v34, %v808_v37 }
 0x14a   :  { %v930_v24 = vand.u32 2147483647, %v929_v2 }
 0x14b   :  { %v812_v7 = vsub.s32 0, %v810_v4 }
 0x14c   :  { %v933_v38 = vmul.f32 %v932_v54, %v930_v24 }
 0x14d   :  { %v1035_v43 = vmin.u32 %v812_v7, %v810_v4 }
 0x14e   :  { %v934_v63 = vxor.u32 2147483648, %v933_v38 }
 0x14f   :  { %v814_v45 = vclz %v1035_v43 }
 0x150   :  { %v935_v9 = vsel %vm852_vm12, %v934_v63, %v933_v38 }
 0x151   :  { %v938_v16 = vsel %vm851_vm13, %v1643_v19, %v935_v9  ;;  %v1036_v11 = vadd.s32 4294967294, %v814_v45  ;;  %v835_v19 = vsel %vm747_vm4, 0, %v833_v33 }
 0x152   :  { %1113 = vcosq.f32 %v938_v16  ;;  %v839_v35 = vadd.s32 3, %v835_v19 }
 0x153   :  { %1115 = vsinq.f32 %v938_v16  ;;  %vm1037_vm14 = vcmp.lt.s32.totalorder %v1036_v11, 0 }
 0x154   :  { %v817_v59 = vsel %vm1037_vm14, 0, %v1036_v11  ;;  %v840_v44 = vand.u32 3, %v839_v35 }
 0x155   :  { %v818_v1 = vsub.s32 32, %v817_v59  ;;  %v822_v58 = vsub.s32 4294967266, %v817_v59  ;;  %v819_v29 = vshll.u32 %v810_v4, %v817_v59 }
 0x156   :  { %vm845_vm5 = vcmp.eq.s32.totalorder %v840_v44, 2  ;;  %vm842_vm6 = vcmp.eq.s32.totalorder %v840_v44, 0  ;;  %vm841_vm7 = vcmp.lt.s32.totalorder %v840_v44, 2 }
 0x157   :  { %v820_v15 = vshrl.u32 %v802_v25, %v818_v1  ;;  %v823_v3 = vadd.s32 127, %v822_v58 }
 0x159   :  { %v821_v53 = vor.u32 %v820_v15, %v819_v29  ;;  %v824_v14 = vshll.u32 %v823_v3, 23 }
 0x15b   :  { %v825_v12 = vor.u32 4788187, %v824_v14  ;;  %v828_v5 = vcvt.s32.f32 %v821_v53 }
 0x15c   :  { %v1114_v31 = vpop.eup %1113 }
 0x15d   :  { %v1116_v50 = vpop.eup %1115  ;;  %v950_v62 = vxor.u32 2147483648, %v1114_v31  ;;  %v826_v61 = vand.u32 2147483647, %v825_v12 }
 0x15e   :  { %v947_v42 = vxor.u32 2147483648, %v1116_v50 }
 0x15f   :  { %v951_v49 = vsel %vm949_vm15, %v950_v62, %v1116_v50  ;;  %v829_v27 = vmul.f32 %v828_v5, %v826_v61 }
 0x160   :  { %v948_v17 = vsel %vm946_vm0, %v1114_v31, %v947_v42 }
 0x161   :  { %v952_v41 = vsel %vm945_vm1, %v948_v17, %v951_v49  ;;  %v830_v8 = vxor.u32 2147483648, %v829_v27 }
 0x162   :  { %v953_v13 = vsel %vm942_vm2, nan, %v952_v41 }
 0x163   :  { %v961_v18 = vmul.f32 %v953_v13, %v1231_v26  ;;  %v831_v60 = vsel %vm748_vm3, %v830_v8, %v829_v27 }
 0x164   :  { %v834_v30 = vsel %vm747_vm4, %v1704_v10, %v831_v60 }
 0x165   :  { %969 = vst [vmem:[#allocation2 + $0x38] sm:$0xff] %v961_v18  ;;  %1117 = vcosq.f32 %v834_v30 }
 0x166   :  { %1119 = vsinq.f32 %v834_v30 }
 0x16f   :  { %v1118_v6 = vpop.eup %1117 }
 0x170   :  { %v1120_v20 = vpop.eup %1119  ;;  %v846_v21 = vxor.u32 2147483648, %v1118_v6 }
 0x171   :  { %v843_v47 = vxor.u32 2147483648, %v1120_v20 }
 0x172   :  { %v847_v22 = vsel %vm845_vm5, %v846_v21, %v1120_v20 }
 0x173   :  { %v844_v23 = vsel %vm842_vm6, %v1118_v6, %v843_v47 }
 0x174   :  { %v848_v48 = vsel %vm841_vm7, %v844_v23, %v847_v22 }
 0x175   :  { %v849_v57 = vsel %vm838_vm8, nan, %v848_v48 }
 0x176   :  { %v960_v0 = vmul.f32 %v849_v57, %v1231_v26 }
 0x178   :  { %968 = vst [vmem:[#allocation2 + $0x30] sm:$0xff] %v960_v0 }
 0x179   :  { %1155 = shalt.err (!%p1152_p12)
}
 0x17a   :  { %s1156_s19 = scalar_lea.hbm %s1873_s2, 1024 }
 0x17b   :  { %p1157_p13 = scmp.ne.s32.totalorder %s1873_s2, %s1156_s19  ;;  %p1160_p0 = scmp.lt.u32.totalorder %s1156_s19, %s1873_s2 }
 0x17d   :  { %p1162_p1 = pnand %p1160_p0, %p1157_p13 }
 0x17f   :  { %1165 = shalt.err (!%p1162_p1)
}
 0x180   :  { %s1179_s24 = smov 128   ;;  %s1180_s25 = smov 8  }
 0x181   :  { %982 = dma.vmem_to_hbm [thread:$0]  %s977_s3, 1024, %s1873_s2, [#allocation3], %s1179_s24, %s1179_s24, %s1180_s25  }
 0x182   :  { %1166 = dma.done.wait [#allocation3], 1024  }
 0x183   :  { %1167 = vsyncadd [#allocation3], 4294966272 }
 0x184   :  { %1168 = dma.done.wait [#allocation5], 128  }
 0x185   :  { %1169 = vsyncadd [#allocation5], 4294967168 }
 0x186   :  { %999 = vsyncpa [#allocation3], 1 }
 0x187   :  { %1000 = vsyncpa [#allocation5], 1 }

</bundles_post_ra>
